<compile_context>
chip_gen: v7x
topology: tpu7x:2x2x1
jax: 0.10.0
libtpu: 0.0.40
codegen_flags: <defaults>
</compile_context>

<pallas_src>
import jax
import jax.numpy as jnp
from jax.experimental import pallas as pl
from jax.experimental.pallas import tpu as pltpu


def _round_up(n: int, m: int) -> int:
    return ((n + m - 1) // m) * m


def mlp_kernel(x_ref, w1t_ref, b1_ref, w2_ref, b2_ref, o_ref):
    # x_ref  : [b_tile, D_in]   streamed per grid step
    # w1t_ref: [D_in, H]        VMEM-resident (w1 pre-transposed host-side; tiny)
    # b1_ref : [1, H]           VMEM-resident
    # w2_ref : [1, H]           VMEM-resident
    # b2_ref : [1, 1]  (SMEM)   scalar
    # o_ref  : [b_tile, 1]
    x = x_ref[...]

    # Linear1 in canonical [M,K] @ [K,N] orientation -> single MXU pass, and the big x tile
    # is never transposed (only the tiny w1 was transposed, host-side, for free).
    h = jax.lax.dot_general(
        x, w1t_ref[...],
        dimension_numbers=(((1,), (0,)), ((), ())),
        preferred_element_type=jnp.float32,
    )                                                     # [b_tile, H]
    h = jnp.maximum(h + b1_ref[...], 0.0)                 # bias + ReLU (VPU)

    # Linear2 (out_features == 1): VPU multiply + cross-lane (XLU) reduce; frees the MXU.
    z = jnp.sum(h * w2_ref[...], axis=1, keepdims=True)   # [b_tile, 1]
    z = z + b2_ref[0, 0]                                  # scalar bias from SMEM

    # Exact sigmoid: exp rides the EUP slot; z is only [b_tile, 1] so this is ~free.
    o_ref[...] = 1.0 / (1.0 + jnp.exp(-z))


def _choose_b_tile(B, d_in, hidden, vmem_budget_bytes):
    """Pick the batch-tile row count from a VMEM byte budget.

    Per-row VMEM bytes ~= 2 x lane-padded x row (double buffer) + f32 hidden row
    (intermediate) + 2 x lane-padded output row (double buffer).
    """
    d_pad = _round_up(max(d_in, 1), 128)
    h_pad = _round_up(max(hidden, 1), 128)
    bytes_per_row = (2 * d_pad + h_pad + 2 * 128) * 4
    budget_rows = max((vmem_budget_bytes // bytes_per_row) // 8 * 8, 8)

    rows_all = _round_up(B, 8)
    if B > 512:
        # Prefer >= 2 grid steps once the batch is big enough: both v7x TensorCores get
        # tiles and the streamed-x DMA overlaps compute (no fully-exposed DMA).
        rows_half = _round_up(pl.cdiv(B, 2), 8)
        return max(min(budget_rows, rows_half), 8)
    return max(min(budget_rows, rows_all), 8)


def neural_net1_forward(x, w1, b1, w2, b2, *, b_tile=None,
                        vmem_budget_bytes=12 * 1024 * 1024):
    """Forward pass of NeuralNet1.

    x : [B, input_size] float32
    w1: [hidden, input_size], b1: [hidden]   (PyTorch nn.Linear layouts)
    w2: [1, hidden],          b2: [1]
    returns: [B, 1] float32
    """
    B, d_in = x.shape
    hidden = w1.shape[0]

    if b_tile is None:
        b_tile = _choose_b_tile(B, d_in, hidden, vmem_budget_bytes)
    grid = (pl.cdiv(B, b_tile),)   # ragged last tile handled by Pallas (no jnp.pad of x)

    x_f = jnp.asarray(x, jnp.float32)
    w1t = jnp.asarray(w1, jnp.float32).T                    # [d_in, hidden]; tiny, free
    b1_row = jnp.asarray(b1, jnp.float32).reshape(1, hidden)
    w2_row = jnp.asarray(w2, jnp.float32).reshape(1, hidden)
    b2_s = jnp.asarray(b2, jnp.float32).reshape(1, 1)

    out = pl.pallas_call(
        mlp_kernel,
        out_shape=jax.ShapeDtypeStruct((B, 1), jnp.float32),
        grid_spec=pltpu.PrefetchScalarGridSpec(
            num_scalar_prefetch=0,
            grid=grid,
            in_specs=[
                pl.BlockSpec((b_tile, d_in), lambda i: (i, 0)),       # x: streamed
                pl.BlockSpec((d_in, hidden), lambda i: (0, 0)),       # w1^T: resident
                pl.BlockSpec((1, hidden), lambda i: (0, 0)),          # b1: resident
                pl.BlockSpec((1, hidden), lambda i: (0, 0)),          # w2: resident
                pl.BlockSpec(memory_space=pltpu.MemorySpace.SMEM),    # b2: scalar in SMEM
            ],
            out_specs=pl.BlockSpec((b_tile, 1), lambda i: (i, 0)),
        ),
        compiler_params=pltpu.CompilerParams(
            dimension_semantics=("parallel",),       # batch tiles are independent
            vmem_limit_bytes=32 * 1024 * 1024,       # consistent with the byte budget; safe
        ),                                           # on v5e/v6e (128 MiB) and v7x (64 MiB)
    )(x_f, w1t, b1_row, w2_row, b2_s)

    return out


def init_params(key, input_size, hidden_size):
    # Mimics nn.Linear's uniform(-1/sqrt(fan_in), 1/sqrt(fan_in)) init, PyTorch layouts.
    k1, k2, k3, k4 = jax.random.split(key, 4)
    bound1 = input_size ** -0.5
    bound2 = hidden_size ** -0.5
    w1 = jax.random.uniform(k1, (hidden_size, input_size), jnp.float32, -bound1, bound1)
    b1 = jax.random.uniform(k2, (hidden_size,), jnp.float32, -bound1, bound1)
    w2 = jax.random.uniform(k3, (1, hidden_size), jnp.float32, -bound2, bound2)
    b2 = jax.random.uniform(k4, (1,), jnp.float32, -bound2, bound2)
    return w1, b1, w2, b2


def reference_forward(x, w1, b1, w2, b2):
    h = jnp.maximum(x @ w1.T + b1, 0.0)
    return jax.nn.sigmoid(h @ w2.T + b2)


if __name__ == "__main__":
    key = jax.random.PRNGKey(0)
    batch, input_size, hidden_size = 8, 32, 64

    kx, kp, kx2, kx3 = jax.random.split(key, 4)
    x = jax.random.normal(kx, (batch, input_size), jnp.float32)
    w1, b1, w2, b2 = init_params(kp, input_size, hidden_size)

    # Single-tile path.
    y = jax.block_until_ready(neural_net1_forward(x, w1, b1, w2, b2))
    y_ref = reference_forward(x, w1, b1, w2, b2)
    assert y.shape == (batch, 1)
    assert jnp.allclose(y, y_ref, atol=2e-3, rtol=2e-3), "single-tile mismatch"

    # Multi-tile grid with a ragged last tile (no host-side padding of x).
    batch2 = 300
    x2 = jax.random.normal(kx2, (batch2, input_size), jnp.float32)
    y2 = jax.block_until_ready(neural_net1_forward(x2, w1, b1, w2, b2, b_tile=128))
    y2_ref = reference_forward(x2, w1, b1, w2, b2)
    assert y2.shape == (batch2, 1)
    assert jnp.allclose(y2, y2_ref, atol=2e-3, rtol=2e-3), "multi-tile mismatch"

    # Auto tile selection: B > 512 splits into >= 2 grid steps (ragged second step).
    batch3 = 1500
    x3 = jax.random.normal(kx3, (batch3, input_size), jnp.float32)
    y3 = jax.block_until_ready(neural_net1_forward(x3, w1, b1, w2, b2))
    y3_ref = reference_forward(x3, w1, b1, w2, b2)
    assert y3.shape == (batch3, 1)
    assert jnp.allclose(y3, y3_ref, atol=2e-3, rtol=2e-3), "auto-tile mismatch"

    print("KERNEL_OK")
</pallas_src>

<mosaic_0001>
module attributes {stable_mosaic.version = 11 : i64} {
  func.func @mlp_kernel(%arg0: i32, %arg1: memref<8x32xf32, #tpu.memory_space<vmem>>, %arg2: memref<32x64xf32, #tpu.memory_space<vmem>>, %arg3: memref<1x64xf32, #tpu.memory_space<vmem>>, %arg4: memref<1x64xf32, #tpu.memory_space<vmem>>, %arg5: memref<1x1xf32, #tpu.memory_space<smem>>, %arg6: memref<8x1xf32, #tpu.memory_space<vmem>>) attributes {dimension_semantics = [#tpu.dimension_semantics<parallel>], iteration_bounds = array<i64: 1>, scalar_prefetch = 0 : i64, scratch_operands = 0 : i64, tpu.core_type = #tpu.core_type<tc>, window_params = [{transform_indices = @transform_0, window_bounds = array<i64: 8, 32>}, {pipeline_mode = #tpu.pipeline_mode<synchronous>, transform_indices = @transform_1, window_bounds = array<i64: 32, 64>}, {pipeline_mode = #tpu.pipeline_mode<synchronous>, transform_indices = @transform_2, window_bounds = array<i64: 1, 64>}, {pipeline_mode = #tpu.pipeline_mode<synchronous>, transform_indices = @transform_3, window_bounds = array<i64: 1, 64>}, {transform_indices = @transform_4, window_bounds = array<i64: 1, 1>}, {transform_indices = @transform_5, window_bounds = array<i64: 8, 1>}]} {
    %c0 = arith.constant 0 : index
    %c0_0 = arith.constant 0 : index
    %0 = vector.load %arg1[%c0, %c0_0] : memref<8x32xf32, #tpu.memory_space<vmem>>, vector<8x32xf32>
    %c0_1 = arith.constant 0 : index
    %c0_2 = arith.constant 0 : index
    %1 = vector.load %arg2[%c0_1, %c0_2] : memref<32x64xf32, #tpu.memory_space<vmem>>, vector<32x64xf32>
    %cst = arith.constant dense<0.000000e+00> : vector<8x64xf32>
    %2 = tpu.matmul %0, %1, %cst {dimension_numbers = #tpu.dot_dimension_numbers<[1], [0], [0], [1], [0, 0, 1, 1], [], []>} : vector<8x32xf32>, vector<32x64xf32>, vector<8x64xf32> -> vector<8x64xf32>
    %c0_3 = arith.constant 0 : index
    %c0_4 = arith.constant 0 : index
    %3 = vector.load %arg3[%c0_3, %c0_4] : memref<1x64xf32, #tpu.memory_space<vmem>>, vector<1x64xf32>
    %4 = vector.broadcast %3 : vector<1x64xf32> to vector<8x64xf32>
    %5 = arith.addf %2, %4 : vector<8x64xf32>
    %cst_5 = arith.constant 0.000000e+00 : f32
    %6 = vector.broadcast %cst_5 : f32 to vector<8x64xf32>
    %7 = arith.maximumf %5, %6 : vector<8x64xf32>
    %c0_6 = arith.constant 0 : index
    %c0_7 = arith.constant 0 : index
    %8 = vector.load %arg4[%c0_6, %c0_7] : memref<1x64xf32, #tpu.memory_space<vmem>>, vector<1x64xf32>
    %9 = vector.broadcast %8 : vector<1x64xf32> to vector<8x64xf32>
    %10 = arith.mulf %7, %9 : vector<8x64xf32>
    %cst_8 = arith.constant dense<0.000000e+00> : vector<8xf32>
    %11 = vector.multi_reduction <add>, %10, %cst_8 [1] : vector<8x64xf32> to vector<8xf32>
    %12 = vector.shape_cast %11 : vector<8xf32> to vector<8x1xf32>
    %c0_9 = arith.constant 0 : index
    %c0_10 = arith.constant 0 : index
    %13 = memref.load %arg5[%c0_9, %c0_10] : memref<1x1xf32, #tpu.memory_space<smem>>
    %14 = vector.broadcast %13 : f32 to vector<8x1xf32>
    %15 = arith.addf %12, %14 : vector<8x1xf32>
    %cst_11 = arith.constant 0.000000e+00 : f32
    %16 = vector.broadcast %cst_11 : f32 to vector<8x1xf32>
    %17 = arith.subf %16, %15 : vector<8x1xf32>
    %18 = math.exp %17 : vector<8x1xf32>
    %cst_12 = arith.constant 1.000000e+00 : f32
    %19 = vector.broadcast %cst_12 : f32 to vector<8x1xf32>
    %20 = arith.addf %19, %18 : vector<8x1xf32>
    %cst_13 = arith.constant 1.000000e+00 : f32
    %21 = vector.broadcast %cst_13 : f32 to vector<8x1xf32>
    %22 = arith.divf %21, %20 : vector<8x1xf32>
    %c0_14 = arith.constant 0 : index
    %c0_15 = arith.constant 0 : index
    %23 = vector.load %arg6[%c0_14, %c0_15] : memref<8x1xf32, #tpu.memory_space<vmem>>, vector<8x1xf32>
    tpu.vector_store %arg6[%c0_14, %c0_15], %22 {strides = array<i32>} : memref<8x1xf32, #tpu.memory_space<vmem>>, vector<8x1xf32>,
    return
  }
  func.func @transform_0(%arg0: i32) -> (i32, i32) {
    %c0_i32 = arith.constant 0 : i32
    %c0_i32_0 = arith.constant 0 : i32
    return %arg0, %c0_i32 : i32, i32
  }
  func.func @transform_1(%arg0: i32) -> (i32, i32) {
    %c0_i32 = arith.constant 0 : i32
    %c0_i32_0 = arith.constant 0 : i32
    %c0_i32_1 = arith.constant 0 : i32
    return %c0_i32, %c0_i32_0 : i32, i32
  }
  func.func @transform_2(%arg0: i32) -> (i32, i32) {
    %c0_i32 = arith.constant 0 : i32
    %c0_i32_0 = arith.constant 0 : i32
    %c0_i32_1 = arith.constant 0 : i32
    return %c0_i32, %c0_i32_0 : i32, i32
  }
  func.func @transform_3(%arg0: i32) -> (i32, i32) {
    %c0_i32 = arith.constant 0 : i32
    %c0_i32_0 = arith.constant 0 : i32
    %c0_i32_1 = arith.constant 0 : i32
    return %c0_i32, %c0_i32_0 : i32, i32
  }
  func.func @transform_4(%arg0: i32) -> (i32, i32) {
    %c0_i32 = arith.constant 0 : i32
    %c0_i32_0 = arith.constant 0 : i32
    %c0_i32_1 = arith.constant 0 : i32
    return %c0_i32, %c0_i32_0 : i32, i32
  }
  func.func @transform_5(%arg0: i32) -> (i32, i32) {
    %c0_i32 = arith.constant 0 : i32
    %c0_i32_0 = arith.constant 0 : i32
    return %arg0, %c0_i32 : i32, i32
  }
}

</mosaic_0001>

<bundles_post_ra>
// kernel: tpu_custom_call.1
= control target key start
LH: loop header
LB: loop body
LE: loop exit
PB: predicated region body
PF: predicated region fallthrough
CT: control target
= control target key end

     0   :  { %11 = vsyncpa [#allocation4], 0  ;;  %s327_s0 = inlined_call_operand.hbm [shape: f32[8,32], index: 0, kind: input, shape index: {}]   ;;  %s328_s1 = inlined_call_operand.hbm [shape: f32[32,64], index: 1, kind: input, shape index: {}]   ;;  %s329_s2 = inlined_call_operand.vmem [shape: f32[1,64], index: 2, kind: input, shape index: {}]   ;;  %s330_s3 = inlined_call_operand.vmem [shape: f32[1,64], index: 3, kind: input, shape index: {}]   ;;  %s331_s4 = inlined_call_operand.<no memory space> [shape: f32[1,1], index: 4, kind: input, shape index: {}]   ;;  %s332_s5 = inlined_call_operand.vmem [shape: f32[8,1], index: 5, kind: output, shape index: {}]  }
   0x1   :  { %12 = vsyncpa [#allocation6], 0  ;;  %s247_s18 = smov [#allocation3]   ;;  %s248_s20 = smov [#allocation5]  }
   0x2   :  { %s19_s19 = sshll.u32 %s247_s18, 4  ;;  %s28_s21 = sshll.u32 %s248_s20, 4  ;;  %s20_s19 = int_to_ptr.vmem [resolvable:$true] %s19_s19  ;;  %s284_s21 = int_to_ptr.vmem [resolvable:$true] %s28_s21 }
   0x3   :  { %s199_s24 = scalar_lea.hbm %s327_s0, 128 }
   0x4   :  { %p200_p0 = scmp.ne.s32.totalorder %s327_s0, %s199_s24  ;;  %p203_p1 = scmp.lt.u32.totalorder %s199_s24, %s327_s0 }
   0x6   :  { %p205_p2 = pnand %p203_p1, %p200_p0 }
   0x8   :  { %208 = shalt.err (!%p205_p2)
}
   0x9   :  { %s209_s29 = scalar_lea.vmem %s20_s19, 128  ;;  %p214_p4 = scmp.lt.s32.totalorder %s20_s19, %s20_s19 }
   0xa   :  { %p210_p3 = scmp.ne.s32.totalorder %s20_s19, %s209_s29  ;;  %p215_p5 = scmp.lt.s32.totalorder %s209_s29, %s209_s29 }
   0xc   :  { %p216_p6 = por %p215_p5, %p214_p4 }
   0xe   :  { %p217_p7 = pnand %p216_p6, %p210_p3 }
  0x10   :  { %220 = shalt.err (!%p217_p7)
}
  0x11   :  { %22 = dma.hbm_to_vmem [thread:$0]  %s327_s0, 128, %s20_s19, [#allocation4]  }
  0x12   :  { %s221_s9 = scalar_lea.hbm %s328_s1, 512 }
  0x13   :  { %p222_p8 = scmp.ne.s32.totalorder %s328_s1, %s221_s9  ;;  %p225_p9 = scmp.lt.u32.totalorder %s221_s9, %s328_s1 }
  0x15   :  { %p227_p10 = pnand %p225_p9, %p222_p8 }
  0x17   :  { %230 = shalt.err (!%p227_p10)
}
  0x18   :  { %s231_s14 = scalar_lea.vmem %s284_s21, 512  ;;  %p236_p12 = scmp.lt.s32.totalorder %s284_s21, %s284_s21 }
  0x19   :  { %p232_p11 = scmp.ne.s32.totalorder %s284_s21, %s231_s14  ;;  %p237_p13 = scmp.lt.s32.totalorder %s231_s14, %s231_s14 }
  0x1b   :  { %p238_p0 = por %p237_p13, %p236_p12 }
  0x1d   :  { %p239_p1 = pnand %p238_p0, %p232_p11 }
  0x1f   :  { %242 = shalt.err (!%p239_p1)
}
  0x20   :  { %s249_s0 = smov 128   ;;  %s250_s15 = smov 8  }
  0x21   :  { %34 = dma.hbm_to_vmem [thread:$0]  %s328_s1, 512, %s284_s21, [#allocation6], %s249_s0, %s249_s0, %s250_s15  }
  0x22   :  { %243 = dma.done.wait [#allocation4], 128  }
  0x23   :  { %244 = vsyncadd [#allocation4], 4294967168 }
  0x24   :  { %245 = dma.done.wait [#allocation6], 512  }
  0x25   :  { %246 = vsyncadd [#allocation6], 4294966784  ;;  %v251_v0 = vmov 0.0|0.0   ;;  %vm252_vm0 = vmmov 0   ;;  %v253_v1 = vmov 0.0   ;;  %v48_v2 = vld [vmem:[#allocation5] sm:$0xff]  ;;  %v147_v17 = vstv %s331_s4 }
  0x26   :  { %182 = vmatprep.subr.bf16.mxu0 %v251_v0  ;;  %179 = vmatprep.mubr.msk.f32.mxu0 %vm252_vm0, %v253_v1  ;;  %v49_v3 = vld [vmem:[#allocation5 + $0x8] sm:$0xff]  ;;  %v50_v4 = vld [vmem:[#allocation5 + $0x10] sm:$0xff]  ;;  %v51_v6 = vld [vmem:[#allocation5 + $0x18] sm:$0xff]  ;;  %vm59_vm1 = vcmask 261120   ;;  %vm142_vm2 = vcmask 523264   ;;  %vm155_vm3 = vcmask 7168  }
  0x27   :  { %v183_v5 = vpack.c.bf16 %v49_v3, %v48_v2  ;;  %v186_v7 = vpack.c.bf16 %v51_v6, %v50_v4  ;;  %v47_v8 = vld [vmem:[#allocation3] sm:$0xff] }
  0x28   :  { %v163_v9 = vld [vmem:[%s329_s2] ss:$0 sm:$0xff] }
  0x29   :  { %184 = vmatpush3.bf16.msra.mxu0 %v183_v5  ;;  %v165_v13 = vld [vmem:[%s330_s3] ss:$0 sm:$0xff] }
  0x2a   :  { %185 = vmatprep.subr.bf16.mxu0 %v251_v0 }
  0x2d   :  { %187 = vmatpush3.bf16.msra.mxu0 %v186_v7 }
  0x30   :  { %180 = vmatmul.mubr.msk.f32.vlgmr.msra.gmra.mrb[0].mxu0 %vm59_vm1, %v47_v8 }
 0x103   :  { %v129_v10 = vpop.f32.mrb[0].mxu0 }
 0x104   :  { %v130_v11 = vadd.f32 %v163_v9, %v129_v10  ;;  %v181_v12 = vpop.f32.mrb[1].mxu0 }
 0x106   :  { %v133_v14 = vmax.f32 %v130_v11, 0.0 }
 0x108   :  { %v141_v15 = vmul.f32 %v165_v13, %v133_v14 }
 0x10a   :  { %v143_v16 = vsel %vm142_vm2, %v141_v15, 0.0 }
 0x10b   :  { %144 = vadd.xlane.f32.xlu0 %v143_v16 }
 0x198   :  { %v145_v18 = vpop.xlane.xlu0 %144 }
 0x199   :  { %v148_v19 = vadd.f32 %v147_v17, %v145_v18 }
 0x19b   :  { %v149_v20 = vsub.f32 0.0, %v148_v19 }
 0x19d   :  { %v150_v21 = vmul.f32 1.442695, %v149_v20 }
 0x19f   :  { %195 = vpow2.f32 %v150_v21 }
 0x1a9   :  { %v196_v22 = vpop.eup %195 }
 0x1aa   :  { %v152_v23 = vadd.f32 1.0, %v196_v22 }
 0x1ac   :  { %197 = vrcp.f32 %v152_v23 }
 0x1b6   :  { %v198_v24 = vpop.eup %197 }
 0x1b7   :  { %156 = vst.msk [vmem:[%s332_s5] sm:$0xff] %vm155_vm3, %v198_v24 }
 0x1b8   :  { %161 = vsyncpa [#allocation4], 1 }
 0x1b9   :  { %162 = vsyncpa [#allocation6], 1 }

</bundles_post_ra>
